<compile_context>
chip_gen: v7x
topology: tpu7x:2x2x1
jax: 0.10.0
libtpu: 0.0.40
codegen_flags: <defaults>
</compile_context>

<pallas_src>
import math
import functools

import jax
import jax.numpy as jnp
from jax import lax
from jax.experimental import pallas as pl
from jax.experimental.pallas import tpu as pltpu


_VMEM_LIMIT_BYTES = 48 * 1024 * 1024  # headroom on v7x (64 MiB), safe on v5e/v6e


# ---------------------------------------------------------------------------
# Kernel 1: fused KV + Q projections (lane-dense, bf16 MXU, f32 accumulation).
#   kv = x @ [W_k | W_v] + [b_k | b_v]   (single (TR, D) @ (D, 2D) matmul)
#   q  = (y @ W_q + b_q) * 1/sqrt(head_dim)
# ---------------------------------------------------------------------------
def _proj_kernel(x_ref, y_ref, wkv_ref, bkv_ref, wq_ref, bq_ref,
                 k_ref, v_ref, q_ref, *, inv_sqrt_hd, d_model):
    xb = x_ref[0]                                  # (TR, D) bf16  (K/V source)
    yb = y_ref[0]                                  # (TR, D) bf16  (Q source)

    kv = jnp.dot(xb, wkv_ref[...], preferred_element_type=jnp.float32) + bkv_ref[...]
    q = jnp.dot(yb, wq_ref[...], preferred_element_type=jnp.float32) + bq_ref[...]
    q = q * inv_sqrt_hd                            # fold 1/sqrt(hd) into Q once (f32)

    k_ref[0] = kv[:, :d_model].astype(jnp.bfloat16)
    v_ref[0] = kv[:, d_model:].astype(jnp.bfloat16)
    q_ref[0] = q.astype(jnp.bfloat16)


def _qkv_projection(x_bf16, y_bf16, w_kv, b_kv, w_q, b_q, *, head_dim):
    B, S, D = x_bf16.shape
    TR = S if S <= 256 else 256
    assert S % TR == 0 and S % 8 == 0
    grid = (B, S // TR)

    kernel = functools.partial(_proj_kernel,
                               inv_sqrt_hd=1.0 / math.sqrt(head_dim),
                               d_model=D)

    row_spec = pl.BlockSpec((1, TR, D), lambda b, r: (b, r, 0))
    const = lambda shape: pl.BlockSpec(shape, lambda b, r: (0, 0))  # VMEM-resident
    out_sds = jax.ShapeDtypeStruct((B, S, D), jnp.bfloat16)

    return pl.pallas_call(
        kernel,
        out_shape=(out_sds, out_sds, out_sds),
        grid_spec=pltpu.PrefetchScalarGridSpec(
            num_scalar_prefetch=0,
            grid=grid,
            in_specs=[
                row_spec, row_spec,
                const((D, 2 * D)), const((1, 2 * D)),   # [W_k|W_v] (bf16), [b_k|b_v] (f32)
                const((D, D)), const((1, D)),           # W_q (bf16), b_q (f32)
            ],
            out_specs=(row_spec, row_spec, row_spec),
        ),
        compiler_params=pltpu.CompilerParams(
            dimension_semantics=("parallel", "parallel"),
            vmem_limit_bytes=_VMEM_LIMIT_BYTES),
    )(x_bf16, y_bf16, w_kv, b_kv, w_q, b_q)


# ---------------------------------------------------------------------------
# Kernel 2: attention (all heads per step, static unroll) + fused output proj.
#   grid = (batch, q-tile); K/V blocks are the full sequence (resident per batch),
#   W_o / b_o have constant block indices (DMA'd once).
# ---------------------------------------------------------------------------
def _attention_kernel(q_ref, k_ref, v_ref, mask_ref, wo_ref, bo_ref, o_ref,
                      *, num_heads, head_dim):
    q = q_ref[0]            # (TQ, D) bf16, already scaled by 1/sqrt(hd)
    k = k_ref[0]            # (S,  D) bf16
    v = v_ref[0]            # (S,  D) bf16
    mask = mask_ref[0]      # (TQ, S) f32 additive, broadcast over heads

    head_vals = []
    for h in range(num_heads):                      # static unroll (num_heads is small)
        lo = h * head_dim
        q_h = q[:, lo:lo + head_dim]                # static lane slices
        k_h = k[:, lo:lo + head_dim]
        v_h = v[:, lo:lo + head_dim]

        # scores: contract both last dims (no explicit k.T / relayout)
        s = lax.dot_general(q_h, k_h,
                            dimension_numbers=(((1,), (1,)), ((), ())),
                            preferred_element_type=jnp.float32)    # (TQ, S)
        s = s + mask
        # softmax in f32 (finite additive mask -> no NaN rows)
        s = s - jnp.max(s, axis=-1, keepdims=True)
        p = jnp.exp(s)
        p = p * pl.reciprocal(jnp.sum(p, axis=-1, keepdims=True), approx=True)

        head_vals.append(jnp.dot(p.astype(jnp.bfloat16), v_h,
                                 preferred_element_type=jnp.float32))  # (TQ, hd)

    # lane-dense (TQ, D) slab -> ONE full-K output projection on the MXU
    vals = jnp.concatenate(head_vals, axis=-1).astype(jnp.bfloat16)    # (TQ, D)
    out = jnp.dot(vals, wo_ref[...], preferred_element_type=jnp.float32) + bo_ref[...]
    o_ref[0] = out.astype(o_ref.dtype)


def _attention_and_output_proj(q2d, k2d, v2d, mask, w_o, b_o, *,
                               num_heads, head_dim, out_dtype):
    B, S, D = q2d.shape
    TQ = S if S <= 256 else 256
    assert S % TQ == 0 and S % 8 == 0
    grid = (B, S // TQ)

    kernel = functools.partial(_attention_kernel,
                               num_heads=num_heads, head_dim=head_dim)

    return pl.pallas_call(
        kernel,
        out_shape=jax.ShapeDtypeStruct((B, S, D), out_dtype),
        grid_spec=pltpu.PrefetchScalarGridSpec(
            num_scalar_prefetch=0,
            grid=grid,
            in_specs=[
                pl.BlockSpec((1, TQ, D), lambda b, qi: (b, qi, 0)),   # q
                pl.BlockSpec((1, S, D), lambda b, qi: (b, 0, 0)),     # k (full S, resident per b)
                pl.BlockSpec((1, S, D), lambda b, qi: (b, 0, 0)),     # v
                pl.BlockSpec((1, TQ, S), lambda b, qi: (b, qi, 0)),   # mask
                pl.BlockSpec((D, D), lambda b, qi: (0, 0)),           # W_o (resident)
                pl.BlockSpec((1, D), lambda b, qi: (0, 0)),           # b_o (resident)
            ],
            out_specs=pl.BlockSpec((1, TQ, D), lambda b, qi: (b, qi, 0)),
        ),
        compiler_params=pltpu.CompilerParams(
            dimension_semantics=("parallel", "parallel"),
            vmem_limit_bytes=_VMEM_LIMIT_BYTES),
    )(q2d, k2d, v2d, mask, w_o, b_o)


# ---------------------------------------------------------------------------
# Module wrapper (MultiHeadCrossAttention.forward)
# ---------------------------------------------------------------------------
@functools.partial(jax.jit, static_argnames=("num_heads",))
def multi_head_cross_attention(x, y, mask, params, *, num_heads):
    """x: (B,S,D) K/V source; y: (B,S,D) Q source; mask: (B,S,S) additive."""
    B, S, D = x.shape
    assert D % num_heads == 0
    hd = D // num_heads

    # Host-side weight prep: rearrange the PyTorch-layout kv weight (columns per head
    # [k_h | v_h]) into head-major [K | V] = (D, 2D); cast matmul weights to bf16
    # (halves DMA/VMEM), keep biases f32.
    w_kv4 = params["w_kv"].reshape(D, num_heads, 2, hd)
    w_k = w_kv4[:, :, 0, :].reshape(D, D)
    w_v = w_kv4[:, :, 1, :].reshape(D, D)
    w_kv = jnp.concatenate([w_k, w_v], axis=-1).astype(jnp.bfloat16)     # (D, 2D)
    b_kv2 = params["b_kv"].reshape(num_heads, 2, hd)
    b_kv = jnp.concatenate([b_kv2[:, 0, :].reshape(D), b_kv2[:, 1, :].reshape(D)]
                           ).reshape(1, 2 * D)                           # (1, 2D) f32
    w_q = params["w_q"].astype(jnp.bfloat16)
    b_q = params["b_q"].reshape(1, D)
    w_o = params["w_o"].astype(jnp.bfloat16)
    b_o = params["b_o"].reshape(1, D)

    # Activations to bf16 in the wrapper (kernels compute in bf16 anyway).
    x_bf16 = x.astype(jnp.bfloat16)
    y_bf16 = y.astype(jnp.bfloat16)
    mask_f32 = mask.astype(jnp.float32)

    # Kernel 1: fused KV + Q projections, outputs kept lane-dense (B, S, D).
    k2d, v2d, q2d = _qkv_projection(x_bf16, y_bf16, w_kv, b_kv, w_q, b_q,
                                    head_dim=hd)

    # Kernel 2: all-head attention + output projection fused (no head transpose).
    return _attention_and_output_proj(q2d, k2d, v2d, mask_f32, w_o, b_o,
                                       num_heads=num_heads, head_dim=hd,
                                       out_dtype=x.dtype)


# ---------------------------------------------------------------------------
# Parameters + pure-JAX reference (mirrors the PyTorch module, f32 everywhere)
# ---------------------------------------------------------------------------
def init_params(key, *, d_model, scale=0.05):
    ks = jax.random.split(key, 6)
    return {
        # stored as (in, out): forward computes x @ W + b (nn.Linear up to transpose)
        "w_kv": jax.random.normal(ks[0], (d_model, 2 * d_model), jnp.float32) * scale,
        "b_kv": jax.random.normal(ks[1], (2 * d_model,), jnp.float32) * scale,
        "w_q":  jax.random.normal(ks[2], (d_model, d_model), jnp.float32) * scale,
        "b_q":  jax.random.normal(ks[3], (d_model,), jnp.float32) * scale,
        "w_o":  jax.random.normal(ks[4], (d_model, d_model), jnp.float32) * scale,
        "b_o":  jax.random.normal(ks[5], (d_model,), jnp.float32) * scale,
    }


def reference_mhca(x, y, mask, params, *, num_heads):
    B, S, D = x.shape
    hd = D // num_heads
    kv = x @ params["w_kv"] + params["b_kv"]
    q = y @ params["w_q"] + params["b_q"]
    kv = kv.reshape(B, S, num_heads, 2 * hd).transpose(0, 2, 1, 3)
    q = q.reshape(B, S, num_heads, hd).transpose(0, 2, 1, 3)
    k, v = kv[..., :hd], kv[..., hd:]
    s = jnp.einsum("bhqd,bhkd->bhqk", q, k) / math.sqrt(hd)
    s = s + mask[:, None, :, :]
    p = jax.nn.softmax(s, axis=-1)
    vals = jnp.einsum("bhqk,bhkd->bhqd", p, v)
    vals = vals.transpose(0, 2, 1, 3).reshape(B, S, D)
    return vals @ params["w_o"] + params["b_o"]


# ---------------------------------------------------------------------------
if __name__ == "__main__":
    B, S, D, H = 2, 16, 128, 4          # D multiple of 128 -> lane-dense blocks

    key = jax.random.PRNGKey(0)
    kx, ky, kp = jax.random.split(key, 3)
    x = jax.random.normal(kx, (B, S, D), jnp.float32)   # K/V source (encoder output)
    y = jax.random.normal(ky, (B, S, D), jnp.float32)   # Q source   (decoder state)

    # additive mask broadcast over heads (causal, never fully masks a row)
    row = jnp.arange(S)[:, None]
    col = jnp.arange(S)[None, :]
    mask = jnp.where(col <= row, 0.0, -1e9).astype(jnp.float32)
    mask = jnp.broadcast_to(mask, (B, S, S))

    params = init_params(kp, d_model=D)

    out = multi_head_cross_attention(x, y, mask, params, num_heads=H)
    jax.block_until_ready(out)
    assert out.shape == (B, S, D)

    ref = reference_mhca(x, y, mask, params, num_heads=H)
    assert jnp.allclose(out, ref, atol=2e-2, rtol=2e-2), \
        float(jnp.max(jnp.abs(out - ref)))

    print("KERNEL_OK")
</pallas_src>

<mosaic_0001>
module attributes {stable_mosaic.version = 11 : i64} {
  func.func @_proj_kernel(%arg0: i32, %arg1: i32, %arg2: memref<1x16x128xbf16, #tpu.memory_space<vmem>>, %arg3: memref<1x16x128xbf16, #tpu.memory_space<vmem>>, %arg4: memref<128x256xbf16, #tpu.memory_space<vmem>>, %arg5: memref<1x256xf32, #tpu.memory_space<vmem>>, %arg6: memref<128x128xbf16, #tpu.memory_space<vmem>>, %arg7: memref<1x128xf32, #tpu.memory_space<vmem>>, %arg8: memref<1x16x128xbf16, #tpu.memory_space<vmem>>, %arg9: memref<1x16x128xbf16, #tpu.memory_space<vmem>>, %arg10: memref<1x16x128xbf16, #tpu.memory_space<vmem>>) attributes {dimension_semantics = [#tpu.dimension_semantics<parallel>, #tpu.dimension_semantics<parallel>], iteration_bounds = array<i64: 2, 1>, scalar_prefetch = 0 : i64, scratch_operands = 0 : i64, tpu.core_type = #tpu.core_type<tc>, window_params = [{transform_indices = @transform_0, window_bounds = array<i64: 1, 16, 128>}, {transform_indices = @transform_1, window_bounds = array<i64: 1, 16, 128>}, {pipeline_mode = #tpu.pipeline_mode<synchronous>, transform_indices = @transform_2, window_bounds = array<i64: 128, 256>}, {pipeline_mode = #tpu.pipeline_mode<synchronous>, transform_indices = @transform_3, window_bounds = array<i64: 1, 256>}, {pipeline_mode = #tpu.pipeline_mode<synchronous>, transform_indices = @transform_4, window_bounds = array<i64: 128, 128>}, {pipeline_mode = #tpu.pipeline_mode<synchronous>, transform_indices = @transform_5, window_bounds = array<i64: 1, 128>}, {transform_indices = @transform_6, window_bounds = array<i64: 1, 16, 128>}, {transform_indices = @transform_7, window_bounds = array<i64: 1, 16, 128>}, {transform_indices = @transform_8, window_bounds = array<i64: 1, 16, 128>}]} {
    %c0 = arith.constant 0 : index
    %c0_0 = arith.constant 0 : index
    %c0_1 = arith.constant 0 : index
    %0 = vector.load %arg2[%c0, %c0_0, %c0_1] : memref<1x16x128xbf16, #tpu.memory_space<vmem>>, vector<1x16x128xbf16>
    %1 = vector.shape_cast %0 : vector<1x16x128xbf16> to vector<16x128xbf16>
    %c0_2 = arith.constant 0 : index
    %c0_3 = arith.constant 0 : index
    %c0_4 = arith.constant 0 : index
    %2 = vector.load %arg3[%c0_2, %c0_3, %c0_4] : memref<1x16x128xbf16, #tpu.memory_space<vmem>>, vector<1x16x128xbf16>
    %3 = vector.shape_cast %2 : vector<1x16x128xbf16> to vector<16x128xbf16>
    %c0_5 = arith.constant 0 : index
    %c0_6 = arith.constant 0 : index
    %4 = vector.load %arg4[%c0_5, %c0_6] : memref<128x256xbf16, #tpu.memory_space<vmem>>, vector<128x256xbf16>
    %cst = arith.constant dense<0.000000e+00> : vector<16x256xf32>
    %5 = tpu.matmul %1, %4, %cst {dimension_numbers = #tpu.dot_dimension_numbers<[1], [0], [0], [1], [0, 0, 1, 1], [], []>} : vector<16x128xbf16>, vector<128x256xbf16>, vector<16x256xf32> -> vector<16x256xf32>
    %c0_7 = arith.constant 0 : index
    %c0_8 = arith.constant 0 : index
    %6 = vector.load %arg5[%c0_7, %c0_8] : memref<1x256xf32, #tpu.memory_space<vmem>>, vector<1x256xf32>
    %7 = vector.broadcast %6 : vector<1x256xf32> to vector<16x256xf32>
    %8 = arith.addf %5, %7 : vector<16x256xf32>
    %c0_9 = arith.constant 0 : index
    %c0_10 = arith.constant 0 : index
    %9 = vector.load %arg6[%c0_9, %c0_10] : memref<128x128xbf16, #tpu.memory_space<vmem>>, vector<128x128xbf16>
    %cst_11 = arith.constant dense<0.000000e+00> : vector<16x128xf32>
    %10 = tpu.matmul %3, %9, %cst_11 {dimension_numbers = #tpu.dot_dimension_numbers<[1], [0], [0], [1], [0, 0, 1, 1], [], []>} : vector<16x128xbf16>, vector<128x128xbf16>, vector<16x128xf32> -> vector<16x128xf32>
    %c0_12 = arith.constant 0 : index
    %c0_13 = arith.constant 0 : index
    %11 = vector.load %arg7[%c0_12, %c0_13] : memref<1x128xf32, #tpu.memory_space<vmem>>, vector<1x128xf32>
    %12 = vector.broadcast %11 : vector<1x128xf32> to vector<16x128xf32>
    %13 = arith.addf %10, %12 : vector<16x128xf32>
    %cst_14 = arith.constant 0.176776692 : f32
    %14 = vector.broadcast %cst_14 : f32 to vector<16x128xf32>
    %15 = arith.mulf %13, %14 : vector<16x128xf32>
    %16 = vector.extract_strided_slice %8 {offsets = [0, 0], sizes = [16, 128], strides = [1, 1]} : vector<16x256xf32> to vector<16x128xf32>
    %17 = arith.truncf %16 : vector<16x128xf32> to vector<16x128xbf16>
    %c0_15 = arith.constant 0 : index
    %c0_16 = arith.constant 0 : index
    %c0_17 = arith.constant 0 : index
    %18 = vector.load %arg8[%c0_15, %c0_16, %c0_17] : memref<1x16x128xbf16, #tpu.memory_space<vmem>>, vector<1x16x128xbf16>
    %19 = vector.shape_cast %18 : vector<1x16x128xbf16> to vector<16x128xbf16>
    %20 = vector.shape_cast %17 : vector<16x128xbf16> to vector<1x16x128xbf16>
    tpu.vector_store %arg8[%c0_15, %c0_16, %c0_17], %20 {strides = array<i32>} : memref<1x16x128xbf16, #tpu.memory_space<vmem>>, vector<1x16x128xbf16>,
    %21 = vector.extract_strided_slice %8 {offsets = [0, 128], sizes = [16, 128], strides = [1, 1]} : vector<16x256xf32> to vector<16x128xf32>
    %22 = arith.truncf %21 : vector<16x128xf32> to vector<16x128xbf16>
    %c0_18 = arith.constant 0 : index
    %c0_19 = arith.constant 0 : index
    %c0_20 = arith.constant 0 : index
    %23 = vector.load %arg9[%c0_18, %c0_19, %c0_20] : memref<1x16x128xbf16, #tpu.memory_space<vmem>>, vector<1x16x128xbf16>
    %24 = vector.shape_cast %23 : vector<1x16x128xbf16> to vector<16x128xbf16>
    %25 = vector.shape_cast %22 : vector<16x128xbf16> to vector<1x16x128xbf16>
    tpu.vector_store %arg9[%c0_18, %c0_19, %c0_20], %25 {strides = array<i32>} : memref<1x16x128xbf16, #tpu.memory_space<vmem>>, vector<1x16x128xbf16>,
    %26 = arith.truncf %15 : vector<16x128xf32> to vector<16x128xbf16>
    %c0_21 = arith.constant 0 : index
    %c0_22 = arith.constant 0 : index
    %c0_23 = arith.constant 0 : index
    %27 = vector.load %arg10[%c0_21, %c0_22, %c0_23] : memref<1x16x128xbf16, #tpu.memory_space<vmem>>, vector<1x16x128xbf16>
    %28 = vector.shape_cast %27 : vector<1x16x128xbf16> to vector<16x128xbf16>
    %29 = vector.shape_cast %26 : vector<16x128xbf16> to vector<1x16x128xbf16>
    tpu.vector_store %arg10[%c0_21, %c0_22, %c0_23], %29 {strides = array<i32>} : memref<1x16x128xbf16, #tpu.memory_space<vmem>>, vector<1x16x128xbf16>,
    return
  }
  func.func @transform_0(%arg0: i32, %arg1: i32) -> (i32, i32, i32) {
    %c0_i32 = arith.constant 0 : i32
    %c0_i32_0 = arith.constant 0 : i32
    return %arg0, %arg1, %c0_i32 : i32, i32, i32
  }
  func.func @transform_1(%arg0: i32, %arg1: i32) -> (i32, i32, i32) {
    %c0_i32 = arith.constant 0 : i32
    %c0_i32_0 = arith.constant 0 : i32
    return %arg0, %arg1, %c0_i32 : i32, i32, i32
  }
  func.func @transform_2(%arg0: i32, %arg1: i32) -> (i32, i32) {
    %c0_i32 = arith.constant 0 : i32
    %c0_i32_0 = arith.constant 0 : i32
    %c0_i32_1 = arith.constant 0 : i32
    return %c0_i32, %c0_i32_0 : i32, i32
  }
  func.func @transform_3(%arg0: i32, %arg1: i32) -> (i32, i32) {
    %c0_i32 = arith.constant 0 : i32
    %c0_i32_0 = arith.constant 0 : i32
    %c0_i32_1 = arith.constant 0 : i32
    return %c0_i32, %c0_i32_0 : i32, i32
  }
  func.func @transform_4(%arg0: i32, %arg1: i32) -> (i32, i32) {
    %c0_i32 = arith.constant 0 : i32
    %c0_i32_0 = arith.constant 0 : i32
    %c0_i32_1 = arith.constant 0 : i32
    return %c0_i32, %c0_i32_0 : i32, i32
  }
  func.func @transform_5(%arg0: i32, %arg1: i32) -> (i32, i32) {
    %c0_i32 = arith.constant 0 : i32
    %c0_i32_0 = arith.constant 0 : i32
    %c0_i32_1 = arith.constant 0 : i32
    return %c0_i32, %c0_i32_0 : i32, i32
  }
  func.func @transform_6(%arg0: i32, %arg1: i32) -> (i32, i32, i32) {
    %c0_i32 = arith.constant 0 : i32
    %c0_i32_0 = arith.constant 0 : i32
    return %arg0, %arg1, %c0_i32 : i32, i32, i32
  }
  func.func @transform_7(%arg0: i32, %arg1: i32) -> (i32, i32, i32) {
    %c0_i32 = arith.constant 0 : i32
    %c0_i32_0 = arith.constant 0 : i32
    return %arg0, %arg1, %c0_i32 : i32, i32, i32
  }
  func.func @transform_8(%arg0: i32, %arg1: i32) -> (i32, i32, i32) {
    %c0_i32 = arith.constant 0 : i32
    %c0_i32_0 = arith.constant 0 : i32
    return %arg0, %arg1, %c0_i32 : i32, i32, i32
  }
}

module attributes {stable_mosaic.version = 11 : i64} {
  func.func @_attention_kernel(%arg0: i32, %arg1: i32, %arg2: memref<1x16x128xbf16, #tpu.memory_space<vmem>>, %arg3: memref<1x16x128xbf16, #tpu.memory_space<vmem>>, %arg4: memref<1x16x128xbf16, #tpu.memory_space<vmem>>, %arg5: memref<1x16x16xf32, #tpu.memory_space<vmem>>, %arg6: memref<128x128xbf16, #tpu.memory_space<vmem>>, %arg7: memref<1x128xf32, #tpu.memory_space<vmem>>, %arg8: memref<1x16x128xf32, #tpu.memory_space<vmem>>) attributes {dimension_semantics = [#tpu.dimension_semantics<parallel>, #tpu.dimension_semantics<parallel>], iteration_bounds = array<i64: 2, 1>, scalar_prefetch = 0 : i64, scratch_operands = 0 : i64, tpu.core_type = #tpu.core_type<tc>, window_params = [{transform_indices = @transform_0, window_bounds = array<i64: 1, 16, 128>}, {transform_indices = @transform_1, window_bounds = array<i64: 1, 16, 128>}, {transform_indices = @transform_2, window_bounds = array<i64: 1, 16, 128>}, {transform_indices = @transform_3, window_bounds = array<i64: 1, 16, 16>}, {pipeline_mode = #tpu.pipeline_mode<synchronous>, transform_indices = @transform_4, window_bounds = array<i64: 128, 128>}, {pipeline_mode = #tpu.pipeline_mode<synchronous>, transform_indices = @transform_5, window_bounds = array<i64: 1, 128>}, {transform_indices = @transform_6, window_bounds = array<i64: 1, 16, 128>}]} {
    %c0 = arith.constant 0 : index
    %c0_0 = arith.constant 0 : index
    %c0_1 = arith.constant 0 : index
    %0 = vector.load %arg2[%c0, %c0_0, %c0_1] : memref<1x16x128xbf16, #tpu.memory_space<vmem>>, vector<1x16x128xbf16>
    %1 = vector.shape_cast %0 : vector<1x16x128xbf16> to vector<16x128xbf16>
    %c0_2 = arith.constant 0 : index
    %c0_3 = arith.constant 0 : index
    %c0_4 = arith.constant 0 : index
    %2 = vector.load %arg3[%c0_2, %c0_3, %c0_4] : memref<1x16x128xbf16, #tpu.memory_space<vmem>>, vector<1x16x128xbf16>
    %3 = vector.shape_cast %2 : vector<1x16x128xbf16> to vector<16x128xbf16>
    %c0_5 = arith.constant 0 : index
    %c0_6 = arith.constant 0 : index
    %c0_7 = arith.constant 0 : index
    %4 = vector.load %arg4[%c0_5, %c0_6, %c0_7] : memref<1x16x128xbf16, #tpu.memory_space<vmem>>, vector<1x16x128xbf16>
    %5 = vector.shape_cast %4 : vector<1x16x128xbf16> to vector<16x128xbf16>
    %c0_8 = arith.constant 0 : index
    %c0_9 = arith.constant 0 : index
    %c0_10 = arith.constant 0 : index
    %6 = vector.load %arg5[%c0_8, %c0_9, %c0_10] : memref<1x16x16xf32, #tpu.memory_space<vmem>>, vector<1x16x16xf32>
    %7 = vector.shape_cast %6 : vector<1x16x16xf32> to vector<16x16xf32>
    %8 = vector.extract_strided_slice %1 {offsets = [0, 0], sizes = [16, 32], strides = [1, 1]} : vector<16x128xbf16> to vector<16x32xbf16>
    %9 = vector.extract_strided_slice %3 {offsets = [0, 0], sizes = [16, 32], strides = [1, 1]} : vector<16x128xbf16> to vector<16x32xbf16>
    %10 = vector.extract_strided_slice %5 {offsets = [0, 0], sizes = [16, 32], strides = [1, 1]} : vector<16x128xbf16> to vector<16x32xbf16>
    %cst = arith.constant dense<0.000000e+00> : vector<16x16xf32>
    %11 = tpu.matmul %8, %9, %cst {dimension_numbers = #tpu.dot_dimension_numbers<[1], [1], [0], [0], [0, 0, 1, 0], [], []>} : vector<16x32xbf16>, vector<16x32xbf16>, vector<16x16xf32> -> vector<16x16xf32>
    %12 = arith.addf %11, %7 : vector<16x16xf32>
    %cst_11 = arith.constant dense<0xFF800000> : vector<16xf32>
    %13 = vector.multi_reduction <maximumf>, %12, %cst_11 [1] : vector<16x16xf32> to vector<16xf32>
    %14 = vector.shape_cast %13 : vector<16xf32> to vector<16x1xf32>
    %15 = vector.broadcast %14 : vector<16x1xf32> to vector<16x16xf32>
    %16 = arith.subf %12, %15 : vector<16x16xf32>
    %17 = math.exp %16 : vector<16x16xf32>
    %cst_12 = arith.constant dense<0.000000e+00> : vector<16xf32>
    %18 = vector.multi_reduction <add>, %17, %cst_12 [1] : vector<16x16xf32> to vector<16xf32>
    %19 = vector.shape_cast %18 : vector<16xf32> to vector<16x1xf32>
    %20 = tpu.reciprocal %19 {approx = true} : vector<16x1xf32> -> vector<16x1xf32>
    %21 = vector.broadcast %20 : vector<16x1xf32> to vector<16x16xf32>
    %22 = arith.mulf %17, %21 : vector<16x16xf32>
    %23 = arith.truncf %22 : vector<16x16xf32> to vector<16x16xbf16>
    %cst_13 = arith.constant dense<0.000000e+00> : vector<16x32xf32>
    %24 = tpu.matmul %23, %10, %cst_13 {dimension_numbers = #tpu.dot_dimension_numbers<[1], [0], [0], [1], [0, 0, 1, 1], [], []>} : vector<16x16xbf16>, vector<16x32xbf16>, vector<16x32xf32> -> vector<16x32xf32>
    %25 = vector.extract_strided_slice %1 {offsets = [0, 32], sizes = [16, 32], strides = [1, 1]} : vector<16x128xbf16> to vector<16x32xbf16>
    %26 = vector.extract_strided_slice %3 {offsets = [0, 32], sizes = [16, 32], strides = [1, 1]} : vector<16x128xbf16> to vector<16x32xbf16>
    %27 = vector.extract_strided_slice %5 {offsets = [0, 32], sizes = [16, 32], strides = [1, 1]} : vector<16x128xbf16> to vector<16x32xbf16>
    %cst_14 = arith.constant dense<0.000000e+00> : vector<16x16xf32>
    %28 = tpu.matmul %25, %26, %cst_14 {dimension_numbers = #tpu.dot_dimension_numbers<[1], [1], [0], [0], [0, 0, 1, 0], [], []>} : vector<16x32xbf16>, vector<16x32xbf16>, vector<16x16xf32> -> vector<16x16xf32>
    %29 = arith.addf %28, %7 : vector<16x16xf32>
    %cst_15 = arith.constant dense<0xFF800000> : vector<16xf32>
    %30 = vector.multi_reduction <maximumf>, %29, %cst_15 [1] : vector<16x16xf32> to vector<16xf32>
    %31 = vector.shape_cast %30 : vector<16xf32> to vector<16x1xf32>
    %32 = vector.broadcast %31 : vector<16x1xf32> to vector<16x16xf32>
    %33 = arith.subf %29, %32 : vector<16x16xf32>
    %34 = math.exp %33 : vector<16x16xf32>
    %cst_16 = arith.constant dense<0.000000e+00> : vector<16xf32>
    %35 = vector.multi_reduction <add>, %34, %cst_16 [1] : vector<16x16xf32> to vector<16xf32>
    %36 = vector.shape_cast %35 : vector<16xf32> to vector<16x1xf32>
    %37 = tpu.reciprocal %36 {approx = true} : vector<16x1xf32> -> vector<16x1xf32>
    %38 = vector.broadcast %37 : vector<16x1xf32> to vector<16x16xf32>
    %39 = arith.mulf %34, %38 : vector<16x16xf32>
    %40 = arith.truncf %39 : vector<16x16xf32> to vector<16x16xbf16>
    %cst_17 = arith.constant dense<0.000000e+00> : vector<16x32xf32>
    %41 = tpu.matmul %40, %27, %cst_17 {dimension_numbers = #tpu.dot_dimension_numbers<[1], [0], [0], [1], [0, 0, 1, 1], [], []>} : vector<16x16xbf16>, vector<16x32xbf16>, vector<16x32xf32> -> vector<16x32xf32>
    %42 = vector.extract_strided_slice %1 {offsets = [0, 64], sizes = [16, 32], strides = [1, 1]} : vector<16x128xbf16> to vector<16x32xbf16>
    %43 = vector.extract_strided_slice %3 {offsets = [0, 64], sizes = [16, 32], strides = [1, 1]} : vector<16x128xbf16> to vector<16x32xbf16>
    %44 = vector.extract_strided_slice %5 {offsets = [0, 64], sizes = [16, 32], strides = [1, 1]} : vector<16x128xbf16> to vector<16x32xbf16>
    %cst_18 = arith.constant dense<0.000000e+00> : vector<16x16xf32>
    %45 = tpu.matmul %42, %43, %cst_18 {dimension_numbers = #tpu.dot_dimension_numbers<[1], [1], [0], [0], [0, 0, 1, 0], [], []>} : vector<16x32xbf16>, vector<16x32xbf16>, vector<16x16xf32> -> vector<16x16xf32>
    %46 = arith.addf %45, %7 : vector<16x16xf32>
    %cst_19 = arith.constant dense<0xFF800000> : vector<16xf32>
    %47 = vector.multi_reduction <maximumf>, %46, %cst_19 [1] : vector<16x16xf32> to vector<16xf32>
    %48 = vector.shape_cast %47 : vector<16xf32> to vector<16x1xf32>
    %49 = vector.broadcast %48 : vector<16x1xf32> to vector<16x16xf32>
    %50 = arith.subf %46, %49 : vector<16x16xf32>
    %51 = math.exp %50 : vector<16x16xf32>
    %cst_20 = arith.constant dense<0.000000e+00> : vector<16xf32>
    %52 = vector.multi_reduction <add>, %51, %cst_20 [1] : vector<16x16xf32> to vector<16xf32>
    %53 = vector.shape_cast %52 : vector<16xf32> to vector<16x1xf32>
    %54 = tpu.reciprocal %53 {approx = true} : vector<16x1xf32> -> vector<16x1xf32>
    %55 = vector.broadcast %54 : vector<16x1xf32> to vector<16x16xf32>
    %56 = arith.mulf %51, %55 : vector<16x16xf32>
    %57 = arith.truncf %56 : vector<16x16xf32> to vector<16x16xbf16>
    %cst_21 = arith.constant dense<0.000000e+00> : vector<16x32xf32>
    %58 = tpu.matmul %57, %44, %cst_21 {dimension_numbers = #tpu.dot_dimension_numbers<[1], [0], [0], [1], [0, 0, 1, 1], [], []>} : vector<16x16xbf16>, vector<16x32xbf16>, vector<16x32xf32> -> vector<16x32xf32>
    %59 = vector.extract_strided_slice %1 {offsets = [0, 96], sizes = [16, 32], strides = [1, 1]} : vector<16x128xbf16> to vector<16x32xbf16>
    %60 = vector.extract_strided_slice %3 {offsets = [0, 96], sizes = [16, 32], strides = [1, 1]} : vector<16x128xbf16> to vector<16x32xbf16>
    %61 = vector.extract_strided_slice %5 {offsets = [0, 96], sizes = [16, 32], strides = [1, 1]} : vector<16x128xbf16> to vector<16x32xbf16>
    %cst_22 = arith.constant dense<0.000000e+00> : vector<16x16xf32>
    %62 = tpu.matmul %59, %60, %cst_22 {dimension_numbers = #tpu.dot_dimension_numbers<[1], [1], [0], [0], [0, 0, 1, 0], [], []>} : vector<16x32xbf16>, vector<16x32xbf16>, vector<16x16xf32> -> vector<16x16xf32>
    %63 = arith.addf %62, %7 : vector<16x16xf32>
    %cst_23 = arith.constant dense<0xFF800000> : vector<16xf32>
    %64 = vector.multi_reduction <maximumf>, %63, %cst_23 [1] : vector<16x16xf32> to vector<16xf32>
    %65 = vector.shape_cast %64 : vector<16xf32> to vector<16x1xf32>
    %66 = vector.broadcast %65 : vector<16x1xf32> to vector<16x16xf32>
    %67 = arith.subf %63, %66 : vector<16x16xf32>
    %68 = math.exp %67 : vector<16x16xf32>
    %cst_24 = arith.constant dense<0.000000e+00> : vector<16xf32>
    %69 = vector.multi_reduction <add>, %68, %cst_24 [1] : vector<16x16xf32> to vector<16xf32>
    %70 = vector.shape_cast %69 : vector<16xf32> to vector<16x1xf32>
    %71 = tpu.reciprocal %70 {approx = true} : vector<16x1xf32> -> vector<16x1xf32>
    %72 = vector.broadcast %71 : vector<16x1xf32> to vector<16x16xf32>
    %73 = arith.mulf %68, %72 : vector<16x16xf32>
    %74 = arith.truncf %73 : vector<16x16xf32> to vector<16x16xbf16>
    %cst_25 = arith.constant dense<0.000000e+00> : vector<16x32xf32>
    %75 = tpu.matmul %74, %61, %cst_25 {dimension_numbers = #tpu.dot_dimension_numbers<[1], [0], [0], [1], [0, 0, 1, 1], [], []>} : vector<16x16xbf16>, vector<16x32xbf16>, vector<16x32xf32> -> vector<16x32xf32>
    %76 = tpu.concatenate %24, %41, %58, %75 in 1 : vector<16x32xf32>, vector<16x32xf32>, vector<16x32xf32>, vector<16x32xf32> -> vector<16x128xf32>
    %77 = arith.truncf %76 : vector<16x128xf32> to vector<16x128xbf16>
    %c0_26 = arith.constant 0 : index
    %c0_27 = arith.constant 0 : index
    %78 = vector.load %arg6[%c0_26, %c0_27] : memref<128x128xbf16, #tpu.memory_space<vmem>>, vector<128x128xbf16>
    %cst_28 = arith.constant dense<0.000000e+00> : vector<16x128xf32>
    %79 = tpu.matmul %77, %78, %cst_28 {dimension_numbers = #tpu.dot_dimension_numbers<[1], [0], [0], [1], [0, 0, 1, 1], [], []>} : vector<16x128xbf16>, vector<128x128xbf16>, vector<16x128xf32> -> vector<16x128xf32>
    %c0_29 = arith.constant 0 : index
    %c0_30 = arith.constant 0 : index
    %80 = vector.load %arg7[%c0_29, %c0_30] : memref<1x128xf32, #tpu.memory_space<vmem>>, vector<1x128xf32>
    %81 = vector.broadcast %80 : vector<1x128xf32> to vector<16x128xf32>
    %82 = arith.addf %79, %81 : vector<16x128xf32>
    %c0_31 = arith.constant 0 : index
    %c0_32 = arith.constant 0 : index
    %c0_33 = arith.constant 0 : index
    %83 = vector.load %arg8[%c0_31, %c0_32, %c0_33] : memref<1x16x128xf32, #tpu.memory_space<vmem>>, vector<1x16x128xf32>
    %84 = vector.shape_cast %83 : vector<1x16x128xf32> to vector<16x128xf32>
    %85 = vector.shape_cast %82 : vector<16x128xf32> to vector<1x16x128xf32>
    tpu.vector_store %arg8[%c0_31, %c0_32, %c0_33], %85 {strides = array<i32>} : memref<1x16x128xf32, #tpu.memory_space<vmem>>, vector<1x16x128xf32>,
    return
  }
  func.func @transform_0(%arg0: i32, %arg1: i32) -> (i32, i32, i32) {
    %c0_i32 = arith.constant 0 : i32
    %c0_i32_0 = arith.constant 0 : i32
    return %arg0, %arg1, %c0_i32 : i32, i32, i32
  }
  func.func @transform_1(%arg0: i32, %arg1: i32) -> (i32, i32, i32) {
    %c0_i32 = arith.constant 0 : i32
    %c0_i32_0 = arith.constant 0 : i32
    %c0_i32_1 = arith.constant 0 : i32
    return %arg0, %c0_i32, %c0_i32_0 : i32, i32, i32
  }
  func.func @transform_2(%arg0: i32, %arg1: i32) -> (i32, i32, i32) {
    %c0_i32 = arith.constant 0 : i32
    %c0_i32_0 = arith.constant 0 : i32
    %c0_i32_1 = arith.constant 0 : i32
    return %arg0, %c0_i32, %c0_i32_0 : i32, i32, i32
  }
  func.func @transform_3(%arg0: i32, %arg1: i32) -> (i32, i32, i32) {
    %c0_i32 = arith.constant 0 : i32
    %c0_i32_0 = arith.constant 0 : i32
    return %arg0, %arg1, %c0_i32 : i32, i32, i32
  }
  func.func @transform_4(%arg0: i32, %arg1: i32) -> (i32, i32) {
    %c0_i32 = arith.constant 0 : i32
    %c0_i32_0 = arith.constant 0 : i32
    %c0_i32_1 = arith.constant 0 : i32
    return %c0_i32, %c0_i32_0 : i32, i32
  }
  func.func @transform_5(%arg0: i32, %arg1: i32) -> (i32, i32) {
    %c0_i32 = arith.constant 0 : i32
    %c0_i32_0 = arith.constant 0 : i32
    %c0_i32_1 = arith.constant 0 : i32
    return %c0_i32, %c0_i32_0 : i32, i32
  }
  func.func @transform_6(%arg0: i32, %arg1: i32) -> (i32, i32, i32) {
    %c0_i32 = arith.constant 0 : i32
    %c0_i32_0 = arith.constant 0 : i32
    return %arg0, %arg1, %c0_i32 : i32, i32, i32
  }
}

</mosaic_0001>

<bundles_post_ra>
// kernel: squeeze.6
= control target key start
LH: loop header
LB: loop body
LE: loop exit
PB: predicated region body
PF: predicated region fallthrough
CT: control target
= control target key end

     0   :  { %vm7_vm0 = vcmask 261120   ;;  %s37_s8 = smov 32   ;;  %s38_s9 = smov 64   ;;  %vm13_vm1 = vcmask 1048320   ;;  %vm19_vm2 = vcmask 785920   ;;  %vm25_vm3 = vcmask 523520   ;;  %s55_s0 = inlined_call_operand.vmem [shape: f32[4,32], index: 0, kind: input, shape index: {}]   ;;  %s56_s1 = inlined_call_operand.vmem [shape: f32[128], index: 1, kind: output, shape index: {}]  }
   0x1   :  { %v4_v0 = vld [vmem:[%s55_s0] sm:$0xf]  ;;  %s36_s0 = smov 96  }
   0x2   :  { %5 = vst [vmem:[#allocation1] sm:$0xf] %v4_v0 }
   0x9   :  { %v10_v1 = vld [vmem:[#allocation1 + $0x3] sm:$0x1]   ;;  %v22_v2 = vld [vmem:[#allocation1 + $0x1] sm:$0x1]   ;;  %v6_v3 = vld [vmem:[#allocation1] sm:$0x1]  }
   0xa   :  { %11 = vrot.lane.b32.xlu0 %v10_v1, %s36_s0  ;;  %23 = vrot.lane.b32.xlu1 %v22_v2, %s37_s8  ;;  %v16_v4 = vld [vmem:[#allocation1 + $0x2] sm:$0x1]   ;;  %8 = vst.msk [vmem:[#allocation0] sm:$0x1] %vm7_vm0, %v6_v3  }
   0xe   :  { %17 = vrot.lane.b32.xlu0 %v16_v4, %s38_s9 }
  0x7c   :  { %v12_v5 = vpop.permute.xlu0 %11   ;;  %v24_v6 = vpop.permute.xlu1 %23  }
  0x7d   :  { %14 = vst.msk [vmem:[#allocation0] sm:$0x1] %vm13_vm1, %v12_v5  }
  0x80   :  { %v18_v7 = vpop.permute.xlu0 %17  }
  0x81   :  { %20 = vst.msk [vmem:[#allocation0] sm:$0x1] %vm19_vm2, %v18_v7  }
  0x82   :  { %26 = vst.msk [vmem:[#allocation0] sm:$0x1] %vm25_vm3, %v24_v6  }
  0x89   :  { %v30_v8 = vld [vmem:[#allocation0] sm:$0x1] }
  0x8a   :  { %32 = vst [vmem:[%s56_s1] sm:$0x1] %v30_v8 }

// kernel: multi_head_cross_attention.2
= control target key start
LH: loop header
LB: loop body
LE: loop exit
PB: predicated region body
PF: predicated region fallthrough
CT: control target
= control target key end

     0   :  { %s1183_s27 = smov 0   ;;  %s1185_s28 = smov 0   ;;  %s1314_s0 = inlined_call_operand.vmem [shape: bf16[2,16,128], index: 0, kind: input, shape index: {}]   ;;  %s1315_s1 = inlined_call_operand.vmem [shape: bf16[2,16,128], index: 1, kind: input, shape index: {}]   ;;  %s1316_s2 = inlined_call_operand.vmem [shape: bf16[128,256], index: 2, kind: input, shape index: {}]   ;;  %s1317_s3 = inlined_call_operand.vmem [shape: f32[1,256], index: 3, kind: input, shape index: {}]   ;;  %s1318_s4 = inlined_call_operand.vmem [shape: bf16[128,128], index: 4, kind: input, shape index: {}]   ;;  %s1319_s5 = inlined_call_operand.vmem [shape: f32[1,128], index: 5, kind: input, shape index: {}]   ;;  %s1320_s6 = inlined_call_operand.vmem [shape: bf16[2,16,128], index: 6, kind: output, shape index: {0}]   ;;  %s1321_s7 = inlined_call_operand.vmem [shape: bf16[2,16,128], index: 7, kind: output, shape index: {1}]   ;;  %s1322_s8 = inlined_call_operand.vmem [shape: bf16[2,16,128], index: 8, kind: output, shape index: {2}]  }
   0x1   :  { %s1187_s29 = smov 0  }
   0x2 LB: > { %s31_s30 = sadd.s32 1, %s1129_s28  ;;  %p949_p0 = scmp.ge.s32.totalorder %s1133_s29, 1  ;;  %s1133_s29 = sphi %s1187_s29, %s19_s29   ;;  %s1129_s28 = sphi %s1185_s28, %s1324_s28   ;;  %s1125_s27 = sphi %s1183_s27, %s1323_s27  }
   0x3   : > { %p33_p1 = scmp.ge.s32.totalorder %s31_s30, 2  ;;  %p309_p2 = scmp.lt.s32.totalorder %s1133_s29, 3 }
   0x5   : > { %s1326_s30 = smov (%p33_p1, %s31_s30), 0  ;;  %p310_p3 = pnand %p949_p0, %p309_p2 }
   0x6   : > { %v1077_v0 = vld [vmem:[%s1316_s2 + $0x4] ss:$8 sps:$4 sm:$0xff] (!%p310_p3)   ;;  %v1135_v1 = vmov (!%p310_p3), 0.0   ;;  %vm1136_vm0 = vmmov (!%p310_p3), 0   ;;  %v1080_v3 = vld [vmem:[%s1316_s2] ss:$8 sps:$4 sm:$0xff] (!%p310_p3)   ;;  %v451_v28 = vlaneseq (!%p310_p3) }
   0x7   : > { %313 = sbr.rel (%p310_p3) target bundleno = 261 (0x105), region = 44  ;;  %1030 = vmatprep.subr.bf16.mxu1 (!%p310_p3), %v1135_v1  ;;  %v1079_v2 = vld [vmem:[%s1318_s4] sm:$0xff] (!%p310_p3)   ;;  %1046 = vmatprep.mubr.msk.bf16.mxu1 (!%p310_p3), %vm1136_vm0, %v1135_v1  ;;  %v1137_v4 = vmov (!%p310_p3), 0   ;;  %v1081_v5 = vld [vmem:[%s1316_s2 + $0x14] ss:$8 sps:$4 sm:$0xff] (!%p310_p3)   ;;  %v1083_v6 = vld [vmem:[%s1318_s4 + $0x8] sm:$0xff] (!%p310_p3)  }
   0x8   : > { %547 = vmatprep.subr.bf16.mxu0 (!%p310_p3), %v1077_v0  ;;  %579 = vmatprep.mubr.bf16.mxu0 (!%p310_p3), %v1137_v4  ;;  %v1084_v7 = vld [vmem:[%s1316_s2 + $0x10] ss:$8 sps:$4 sm:$0xff] (!%p310_p3)   ;;  %v1085_v8 = vld [vmem:[%s1316_s2 + $0x24] ss:$8 sps:$4 sm:$0xff] (!%p310_p3)   ;;  %p379_p4 = scmp.lt.s32.totalorder (!%p310_p3), %s1125_s27, 1  ;;  %v452_v29 = vshrl.u32 (!%p310_p3), %v451_v28, 7 }
   0x9   : > { %1031 = vmatpush3.bf16.msra.mxu1 (!%p310_p3), %v1079_v2  ;;  %548 = vmatpush1.bf16.msra.mxu0 (!%p310_p3), %v1080_v3  ;;  %v1087_v9 = vld [vmem:[%s1318_s4 + $0x10] sm:$0xff] (!%p310_p3)   ;;  %v1088_v10 = vld [vmem:[%s1316_s2 + $0x20] ss:$8 sps:$4 sm:$0xff] (!%p310_p3)   ;;  %v1091_v12 = vld [vmem:[%s1318_s4 + $0x18] sm:$0xff] (!%p310_p3)  }
   0xa   : > { %1032 = vmatprep.subr.bf16.mxu1 (!%p310_p3), %v1135_v1  ;;  %549 = vmatprep.subr.bf16.mxu0 (!%p310_p3), %v1081_v5  ;;  %v1089_v11 = vld [vmem:[%s1316_s2 + $0x34] ss:$8 sps:$4 sm:$0xff] (!%p310_p3)   ;;  %v1092_v13 = vld [vmem:[%s1316_s2 + $0x30] ss:$8 sps:$4 sm:$0xff] (!%p310_p3)   ;;  %v1093_v14 = vld [vmem:[%s1316_s2 + $0x44] ss:$8 sps:$4 sm:$0xff] (!%p310_p3)  }
   0xb   : > { %v1095_v15 = vld [vmem:[%s1318_s4 + $0x20] sm:$0xff] (!%p310_p3)   ;;  %v1097_v17 = vld [vmem:[%s1316_s2 + $0x54] ss:$8 sps:$4 sm:$0xff] (!%p310_p3)   ;;  %v1099_v18 = vld [vmem:[%s1318_s4 + $0x28] sm:$0xff] (!%p310_p3)   ;;  %v453_v30 = vsub.s32 (!%p310_p3), 0, %v452_v29  ;;  %v457_v32 = vsub.s32 (!%p310_p3), 1, %v452_v29 }
   0xc   : > { %v1096_v16 = vld [vmem:[%s1316_s2 + $0x40] ss:$8 sps:$4 sm:$0xff] (!%p310_p3)   ;;  %v1100_v19 = vld [vmem:[%s1316_s2 + $0x50] ss:$8 sps:$4 sm:$0xff] (!%p310_p3)   ;;  %v1101_v20 = vld [vmem:[%s1316_s2 + $0x64] ss:$8 sps:$4 sm:$0xff] (!%p310_p3)  }
   0xd   : > { %1033 = vmatpush3.bf16.msra.mxu1 (!%p310_p3), %v1083_v6  ;;  %550 = vmatpush1.bf16.msra.mxu0 (!%p310_p3), %v1084_v7  ;;  %v1103_v21 = vld [vmem:[%s1318_s4 + $0x30] sm:$0xff] (!%p310_p3)   ;;  %v1104_v22 = vld [vmem:[%s1316_s2 + $0x60] ss:$8 sps:$4 sm:$0xff] (!%p310_p3)   ;;  %v1107_v24 = vld [vmem:[%s1318_s4 + $0x38] sm:$0xff] (!%p310_p3)  }
   0xe   : > { %1034 = vmatprep.subr.bf16.mxu1 %v1135_v1  ;;  %551 = vmatprep.subr.bf16.mxu0 %v1085_v8  ;;  %s1328_s27 = smov (!%p379_p4, %s1125_s27), 1  ;;  %v1105_v23 = vld [vmem:[%s1316_s2 + $0x74] ss:$8 sps:$4 sm:$0xff]   ;;  %v1108_v25 = vld [vmem:[%s1316_s2 + $0x70] ss:$8 sps:$4 sm:$0xff]  }
   0xf   : > { %s1244_s17 = sshll.u32 %s1328_s27, 3  ;;  %v449_v31 = vld [vmem:[%s1317_s3] sm:$0x3] }
  0x10   : > { %s396_s25 = scalar_lea.vmem %s1315_s1, %s1244_s17  ;;  %s386_s10 = scalar_lea.vmem %s1314_s0, %s1244_s17  ;;  %v977_v33 = vld [vmem:[%s1319_s5] ss:$0 sm:$0xff]  ;;  %v454_v35 = vrot.slane %v449_v31, %v453_v30  ;;  %v458_v39 = vrot.slane %v449_v31, %v457_v32 }
  0x11   : > { %1035 = vmatpush3.bf16.msra.mxu1 %v1087_v9  ;;  %552 = vmatpush1.bf16.msra.mxu0 %v1088_v10  ;;  %v1109_v26 = vld [vmem:[%s396_s25] sm:$0xff]   ;;  %s406_s15 = scalar_lea.vmem %s1320_s6, %s1244_s17  ;;  %s426_s19 = scalar_lea.vmem %s1322_s8, %s1244_s17 }
  0x12   : > { %1036 = vmatprep.subr.bf16.mxu1 %v1135_v1  ;;  %553 = vmatprep.subr.bf16.mxu0 %v1089_v11  ;;  %v1110_v27 = vld [vmem:[%s386_s10] sm:$0xff]   ;;  %s416_s22 = scalar_lea.vmem %s1321_s7, %s1244_s17 }
  0x15   : > { %1037 = vmatpush3.bf16.msra.mxu1 %v1091_v12  ;;  %554 = vmatpush1.bf16.msra.mxu0 %v1092_v13 }
  0x16   : > { %1038 = vmatprep.subr.bf16.mxu1 %v1135_v1  ;;  %555 = vmatprep.subr.bf16.mxu0 %v1093_v14 }
  0x19   : > { %1039 = vmatpush3.bf16.msra.mxu1 %v1095_v15  ;;  %556 = vmatpush1.bf16.msra.mxu0 %v1096_v16 }
  0x1a   : > { %1040 = vmatprep.subr.bf16.mxu1 %v1135_v1  ;;  %557 = vmatprep.subr.bf16.mxu0 %v1097_v17 }
  0x1d   : > { %1041 = vmatpush3.bf16.msra.mxu1 %v1099_v18  ;;  %558 = vmatpush1.bf16.msra.mxu0 %v1100_v19 }
  0x1e   : > { %1042 = vmatprep.subr.bf16.mxu1 %v1135_v1  ;;  %559 = vmatprep.subr.bf16.mxu0 %v1101_v20 }
  0x21   : > { %1043 = vmatpush3.bf16.msra.mxu1 %v1103_v21  ;;  %560 = vmatpush1.bf16.msra.mxu0 %v1104_v22 }
  0x22   : > { %1044 = vmatprep.subr.bf16.mxu1 %v1135_v1  ;;  %561 = vmatprep.subr.bf16.mxu0 %v1105_v23 }
  0x25   : > { %1045 = vmatpush3.bf16.msra.mxu1 %v1107_v24  ;;  %562 = vmatpush1.bf16.msra.mxu0 %v1108_v25 }
  0x28   : > { %1047 = vmatmul.mubr.bf16.vlgmr.msra.gmra.mrb[0].mxu1 %v1109_v26  ;;  %580 = vmatmul.mubr.bf16.vlgmr.msra.gmra.mrb[0].mxu0 %v1110_v27 }
  0xfb   : > { %v701_v34 = vpop.f32.mrb[0].mxu1  ;;  %v581_v37 = vpop.f32.mrb[0].mxu0 }
  0xfc   : > { %v702_v36 = vadd.f32 %v977_v33, %v701_v34  ;;  %v1048_v38 = vpop.f32.mrb[1].mxu1  ;;  %v583_v40 = vpop.f32.mrb[1].mxu0  ;;  %v582_v45 = vadd.f32 %v581_v37, %v454_v35 }
  0xfd   : > { %v704_v41 = vpop.f32.mrb[2].mxu1  ;;  %v585_v43 = vpop.f32.mrb[2].mxu0  ;;  %v584_v49 = vadd.f32 %v583_v40, %v458_v39 }
  0xfe   : > { %v705_v42 = vadd.f32 %v977_v33, %v704_v41  ;;  %v1049_v44 = vpop.f32.mrb[3].mxu1  ;;  %v586_v46 = vadd.f32 %v585_v43, %v454_v35  ;;  %v587_v47 = vpop.f32.mrb[3].mxu0  ;;  %v708_v48 = vmul.f32 0.17677669, %v702_v36 }
  0xff   : > { %v588_v51 = vadd.f32 %v587_v47, %v458_v39 }
 0x100   : > { %v709_v50 = vmul.f32 0.17677669, %v705_v42  ;;  %v1009_v52 = vpack.c.bf16 %v586_v46, %v582_v45 }
 0x101   : > { %v1014_v54 = vpack.c.bf16 %v588_v51, %v584_v49 }
 0x102   : > { %v1019_v53 = vpack.c.bf16 %v709_v50, %v708_v48  ;;  %1010 = vst [vmem:[%s406_s15] sm:$0xff] %v1009_v52  }
 0x103   : > { %1015 = vst [vmem:[%s416_s22] sm:$0xff] %v1014_v54  }
 0x104   : > { %1020 = vst [vmem:[%s426_s19] sm:$0xff] %v1019_v53  }
 0x105 PF: > { %s19_s29 = sadd.s32 1, %s1133_s29   ;;  %s1323_s27 = smov %s1129_s28 }
 0x106   : > { %p16_p5 = scmp.ge.s32.totalorder %s19_s29, 4   ;;  %s1324_s28 = smov %s1326_s30 }
 0x108   :  { %18 = sbr.rel (!%p16_p5) target bundleno = 2 (0x2), region = 101 }

// kernel: multi_head_cross_attention.3
= control target key start
LH: loop header
LB: loop body
LE: loop exit
PB: predicated region body
PF: predicated region fallthrough
CT: control target
= control target key end

     0   :  { %11 = vsyncpa [#allocation3], 0  ;;  %s1781_s0 = inlined_call_operand.vmem [shape: bf16[2,16,128], index: 0, kind: input, shape index: {}]   ;;  %s1782_s1 = inlined_call_operand.vmem [shape: bf16[2,16,128], index: 1, kind: input, shape index: {}]   ;;  %s1783_s2 = inlined_call_operand.vmem [shape: bf16[2,16,128], index: 2, kind: input, shape index: {}]   ;;  %s1784_s3 = inlined_call_operand.vmem [shape: f32[2,16,16], index: 3, kind: input, shape index: {}]   ;;  %s1785_s4 = inlined_call_operand.vmem [shape: bf16[128,128], index: 4, kind: input, shape index: {}]   ;;  %s1786_s5 = inlined_call_operand.vmem [shape: f32[1,128], index: 5, kind: input, shape index: {}]   ;;  %s1787_s6 = inlined_call_operand.hbm [shape: f32[2,16,128], index: 6, kind: output, shape index: {}]  }
   0x1   :  { %13 = vsyncpa [#allocation3 + $0x1], 0  ;;  %s1525_s21 = smov 0   ;;  %s1527_s22 = smov 0  }
   0x2   :  { %s1529_s23 = smov 0   ;;  %s1531_s24 = smov 0  }
   0x3   :  { %s1533_s25 = smov 0   ;;  %s1535_s26 = smov 0  }
   0x4 LB: > { %s1145_s27 = sadd.s32 4294967295, %s1480_s26   ;;  %s1146_s28 = sadd.s32 4294967294, %s1480_s26   ;;  %s1480_s26 = sphi %s1535_s26, %s19_s26   ;;  %s1476_s25 = sphi %s1533_s25, %s1794_s25   ;;  %s1472_s24 = sphi %s1531_s24, %s1793_s24   ;;  %s1468_s23 = sphi %s1529_s23, %s1792_s23   ;;  %s1464_s22 = sphi %s1527_s22, %s1791_s22   ;;  %s1460_s21 = sphi %s1525_s21, %s1790_s21  }
   0x5   : > { %s31_s29 = sadd.s32 1, %s1476_s25  ;;  %s190_s30 = sadd.s32 1, %s1468_s23 }
   0x6   : > { %p33_p0 = scmp.ge.s32.totalorder %s31_s29, 2  ;;  %p200_p1 = scmp.ne.s32.totalorder %s1468_s23, %s1464_s22 }
   0x7   : > { %p201_p2 = scmp.eq.s32.totalorder %s1145_s27, 1  ;;  %p206_p3 = scmp.ne.s32.totalorder %s1464_s22, %s1460_s21 }
   0x8   : > { %s1796_s29 = smov (%p33_p0, %s31_s29), 0  ;;  %p207_p5 = scmp.eq.s32.totalorder %s1146_s28, 1 }
   0x9   : > { %p1565_p4 = por %p201_p2, %p200_p1  ;;  %s185_s8 = ssub.s32 %s1476_s25, %s1796_s29 }
   0xa   : > { %p1149_p6 = scmp.ge.s32.totalorder %s1480_s26, 1  ;;  %p188_p7 = scmp.eq.s32.totalorder %s185_s8, 0 }
   0xb   : > { %p1572_p8 = por %p207_p5, %p206_p3  ;;  %p273_p9 = scmp.lt.s32.totalorder %s1480_s26, 3 }
   0xc   : > { %s1578_s10 = scalar_select %p188_p7, %s1468_s23, %s190_s30  }
   0xd   : > { %p274_p10 = pnand %p1149_p6, %p273_p9 }
   0xe   : > { %p327_p11 = scmp.lt.s32.totalorder (!%p274_p10), %s1472_s24, 1  ;;  %v1482_v0 = vmov (!%p274_p10), 0.0   ;;  %vm1483_vm0 = vmmov (!%p274_p10), 0   ;;  %vm376_vm1 = vcmask (!%p274_p10), 261120   ;;  %vm424_vm2 = vcmask (!%p274_p10), 130048   ;;  %s1484_s30 = smov (!%p274_p10), 96  }
   0xf   : > { %277 = sbr.rel (%p274_p10) target bundleno = 1707 (0x6ab), region = 44  ;;  %1214 = vmatprep.subr.bf16.mxu0 (!%p274_p10), %v1482_v0  ;;  %1216 = vmatprep.mubr.msk.bf16.mxu0 (!%p274_p10), %vm1483_vm0, %v1482_v0  ;;  %s1485_s8 = smov (!%p274_p10), 32   ;;  %vm887_vm3 = vcmask (!%p274_p10), 523264   ;;  %vm890_vm4 = vcmask (!%p274_p10), 785408  }
  0x10   : > { %1238 = vmatprep.subr.bf16.mxu1 (!%p274_p10), %v1482_v0  ;;  %1240 = vmatprep.mubr.msk.bf16.mxu1 (!%p274_p10), %vm1483_vm0, %v1482_v0  ;;  %s1487_s17 = smov (!%p274_p10), [#allocation2]  }
  0x16   : > { %s328_s11 = scalar_select %p327_p11, %s1472_s24, 1 }
  0x18   : > { %s1588_s12 = sshll.u32 %s328_s11, 3  ;;  %s1187_s19 = sshll.u32 %s328_s11, 4 }
  0x19   : > { %s340_s15 = scalar_lea.vmem %s1782_s1, %s1588_s12  ;;  %s334_s18 = scalar_lea.vmem %s1781_s0, %s1588_s12 }
  0x1a   : > { %v1359_v1 = vld [vmem:[%s340_s15] sm:$0xff]   ;;  %s354_s28 = scalar_lea.vmem %s1784_s3, %s1187_s19  ;;  %s345_s14 = scalar_lea.vmem %s1783_s2, %s1588_s12 }
  0x1b   : > { %v381_v2 = vsel %vm376_vm1, %v1359_v1, 0  ;;  %v1360_v3 = vld [vmem:[%s334_s18] sm:$0xff]   ;;  %v1608_v6 = vld [vmem:[%s354_s28 + $0x8] sm:$0xff]  ;;  %s1486_s15 = smov 64   ;;  %s1188_s11 = sshll.u32 %s1472_s24, 8 }
  0x1c   : > { %1215 = vmatpush3.bf16.xpose.msra.mxu0 %v381_v2  ;;  %v1606_v4 = vld [vmem:[%s354_s28] sm:$0xff]  ;;  %s1733_s12 = scalar_lea.hbm %s1787_s6, %s1188_s11  ;;  %s1406_s18 = sshll.u32 %s1487_s17, 4  ;;  %s1407_s18 = int_to_ptr.vmem [resolvable:$false] %s1406_s18 }
  0x1d   : > { %1220 = vmatprep.subr.bf16.mxu0 %v1482_v0  ;;  %v1623_v24 = vld [vmem:[%s345_s14] sm:$0xff]   ;;  %s1408_s19 = scalar_lea.vmem %s1407_s18, 512 }
  0x23   : > { %1217 = vmatmul.mubr.msk.bf16.vlgmr.msra.gmra.mrb[0].mxu0 %vm376_vm1, %v1360_v3 }
  0x24   : > { %1222 = vmatprep.mubr.msk.bf16.mxu0 %vm1483_vm0, %v1482_v0  ;;  %1221 = vmatpush3.bf16.msra.mxu0 %v1623_v24 }
  0x25   : > { %1226 = vmatprep.subr.bf16.mxu0 %v1482_v0 }
  0xf6   : > { %v417_v5 = vpop.f32.mrb[0].mxu0 }
  0xf7   : > { %v418_v7 = vadd.f32 %v417_v5, %v1606_v4  ;;  %v1218_v8 = vpop.f32.mrb[1].mxu0 }
  0xf8   : > { %v420_v9 = vpop.f32.mrb[2].mxu0 }
  0xf9   : > { %v421_v10 = vadd.f32 %v420_v9, %v1608_v6  ;;  %v1219_v11 = vpop.f32.mrb[3].mxu0  ;;  %v425_v12 = vsel %vm424_vm2, %v418_v7, -inf }
  0xfa   : > { %426 = vmax.xlane.f32.xlu0 %v425_v12 }
  0xfb   : > { %v428_v13 = vsel %vm424_vm2, %v421_v10, -inf }
  0xfe   : > { %429 = vmax.xlane.f32.xlu0 %v428_v13 }
 0x114   : > { %500 = vrot.lane.b32.xlu0 %v1359_v1, %s1484_s30 }
 0x118   : > { %742 = vrot.lane.b32.xlu0 %v1359_v1, %s1485_s8 }
 0x187   : > { %v427_v14 = vpop.xlane.xlu0 %426 }
 0x188   : > { %v431_v15 = vsub.f32 %v418_v7, %v427_v14 }
 0x18a   : > { %v433_v16 = vmul.f32 1.442695, %v431_v15 }
 0x18b   : > { %v430_v17 = vpop.xlane.xlu0 %429 }
 0x18c   : > { %1370 = vpow2.f32 %v433_v16  ;;  %v432_v18 = vsub.f32 %v421_v10, %v430_v17 }
 0x18e   : > { %v435_v19 = vmul.f32 1.442695, %v432_v18 }
 0x18f   : > { %v501_v28 = vpop.permute.xlu0 %500 }
 0x190   : > { %1372 = vpow2.f32 %v435_v19  ;;  %v506_v36 = vsel %vm376_vm1, %v501_v28, 0 }
 0x193   : > { %v743_v35 = vpop.permute.xlu0 %742 }
 0x194   : > { %v748_v39 = vsel %vm376_vm1, %v743_v35, 0 }
 0x196   : > { %v1371_v20 = vpop.eup %1370 }
 0x197   : > { %v437_v21 = vsel %vm424_vm2, %v1371_v20, 0.0 }
 0x198   : > { %438 = vadd.xlane.f32.xlu1 %v437_v21 }
 0x19a   : > { %v1373_v22 = vpop.eup %1372 }
 0x19b   : > { %v440_v23 = vsel %vm424_vm2, %v1373_v22, 0.0 }
 0x19c   : > { %441 = vadd.xlane.f32.xlu1 %v440_v23 }
 0x1ad   : > { %498 = vrot.lane.b32.xlu1 %v1360_v3, %s1484_s30 }
 0x1b1   : > { %621 = vrot.lane.b32.xlu1 %v1359_v1, %s1486_s15 }
 0x1b5   : > { %619 = vrot.lane.b32.xlu1 %v1360_v3, %s1486_s15 }
 0x1b9   : > { %740 = vrot.lane.b32.xlu1 %v1360_v3, %s1485_s8 }
 0x225   : > { %v439_v25 = vpop.xlane.xlu1 %438 }
 0x226   : > { %1374 = vrcp.f32 %v439_v25 }
 0x229   : > { %v442_v26 = vpop.xlane.xlu1 %441 }
 0x22a   : > { %1376 = vrcp.f32 %v442_v26 }
 0x22d   : > { %v499_v27 = vpop.permute.xlu1 %498 }
 0x230   : > { %v1375_v30 = vpop.eup %1374 }
 0x231   : > { %v622_v29 = vpop.permute.xlu1 %621  ;;  %v445_v33 = vmul.f32 %v1375_v30, %v1371_v20 }
 0x232   : > { %v627_v31 = vsel %vm376_vm1, %v622_v29, 0 }
 0x233   : > { %1239 = vmatpush3.bf16.xpose.msra.mxu1 %v627_v31 }
 0x234   : > { %v1377_v32 = vpop.eup %1376  ;;  %1250 = vmatprep.subr.bf16.mxu1 %v1482_v0 }
 0x235   : > { %v446_v34 = vmul.f32 %v1377_v32, %v1373_v22  ;;  %v620_v38 = vpop.permute.xlu1 %619 }
 0x237   : > { %v447_v37 = vpack.c.bf16 %v446_v34, %v445_v33 }
 0x239   : > { %1223 = vmatmul.mubr.msk.bf16.vlgmr.msra.gmra.mrb[4].mxu0 %vm424_vm2, %v447_v37  ;;  %v741_v40 = vpop.permute.xlu1 %740 }
 0x23a   : > { %1227 = vmatpush3.bf16.xpose.msra.mxu0 %v506_v36  ;;  %1241 = vmatmul.mubr.msk.bf16.vlgmr.msra.gmra.mrb[0].mxu1 %vm376_vm1, %v620_v38 }
 0x23b   : > { %1251 = vmatpush3.bf16.xpose.msra.mxu1 %v748_v39  ;;  %1228 = vmatprep.mubr.msk.bf16.mxu0 %vm1483_vm0, %v1482_v0 }
 0x23c   : > { %1252 = vmatprep.mubr.msk.bf16.mxu1 %vm1483_vm0, %v1482_v0  ;;  %1232 = vmatprep.subr.bf16.mxu0 %v1482_v0 }
 0x23d   : > { %1262 = vmatprep.subr.bf16.mxu1 %v1482_v0 }
 0x241   : > { %1229 = vmatmul.mubr.msk.bf16.vlgmr.msra.gmra.mrb[8].mxu0 %vm376_vm1, %v499_v27 }
 0x242   : > { %1253 = vmatmul.mubr.msk.bf16.vlgmr.msra.gmra.mrb[4].mxu1 %vm376_vm1, %v741_v40  ;;  %1234 = vmatprep.mubr.msk.bf16.mxu0 %vm1483_vm0, %v1482_v0 }
 0x243   : > { %1278 = vmatprep.mubr.msk.bf16.mxu1 %vm1483_vm0, %v1482_v0 }
 0x30c   : > { %v1648_v41 = vpop.f32.mrb[4].mxu0 }
 0x30d   : > { %v1224_v42 = vpop.f32.mrb[5].mxu0  ;;  %v663_v43 = vpop.f32.mrb[0].mxu1 }
 0x30e   : > { %v1650_v44 = vpop.f32.mrb[6].mxu0  ;;  %v1242_v45 = vpop.f32.mrb[1].mxu1  ;;  %v664_v55 = vadd.f32 %v663_v43, %v1606_v4 }
 0x30f   : > { %v1225_v46 = vpop.f32.mrb[7].mxu0  ;;  %v666_v47 = vpop.f32.mrb[2].mxu1 }
 0x310   : > { %v1243_v48 = vpop.f32.mrb[3].mxu1  ;;  %v667_v63 = vadd.f32 %v666_v47, %v1608_v6  ;;  %v670_v1 = vsel %vm424_vm2, %v664_v55, -inf }
 0x312   : > { %v673_v5 = vsel %vm424_vm2, %v667_v63, -inf }
 0x314   : > { %v542_v49 = vpop.f32.mrb[8].mxu0 }
 0x315   : > { %v543_v50 = vadd.f32 %v542_v49, %v1606_v4  ;;  %v1230_v51 = vpop.f32.mrb[9].mxu0  ;;  %v784_v52 = vpop.f32.mrb[4].mxu1 }
 0x316   : > { %v545_v53 = vpop.f32.mrb[10].mxu0  ;;  %v1254_v54 = vpop.f32.mrb[5].mxu1  ;;  %v785_v3 = vadd.f32 %v784_v52, %v1606_v4 }
 0x317   : > { %v546_v56 = vadd.f32 %v545_v53, %v1608_v6  ;;  %v1231_v57 = vpop.f32.mrb[11].mxu0  ;;  %v549_v58 = vsel %vm424_vm2, %v543_v50, -inf  ;;  %v787_v59 = vpop.f32.mrb[6].mxu1 }
 0x318   : > { %550 = vmax.xlane.f32.xlu0 %v549_v58  ;;  %v788_v60 = vadd.f32 %v787_v59, %v1608_v6  ;;  %v1255_v61 = vpop.f32.mrb[7].mxu1  ;;  %v791_v7 = vsel %vm424_vm2, %v785_v3, -inf }
 0x319   : > { %v552_v62 = vsel %vm424_vm2, %v546_v56, -inf }
 0x31a   : > { %553 = vmax.xlane.f32.xlu1 %v552_v62  ;;  %v794_v2 = vsel %vm424_vm2, %v788_v60, -inf  ;;  %v1362_v62 = vld [vmem:[%s1785_s4] sm:$0xff]  }
 0x31b   : > { %1263 = vmatpush3.bf16.msra.mxu1 %v1362_v62 }
 0x31c   : > { %671 = vmax.xlane.f32.xlu0 %v670_v1  ;;  %1264 = vmatprep.subr.bf16.mxu1 %v1482_v0  ;;  %v1364_v1 = vld [vmem:[%s1785_s4 + $0x10] sm:$0xff]  }
 0x31e   : > { %795 = vmax.xlane.f32.xlu1 %v794_v2  ;;  %v1365_v2 = vld [vmem:[%s1785_s4 + $0x18] sm:$0xff]  }
 0x320   : > { %674 = vmax.xlane.f32.xlu0 %v673_v5 }
 0x324   : > { %792 = vmax.xlane.f32.xlu0 %v791_v7  ;;  %v1367_v7 = vld [vmem:[%s1785_s4 + $0x28] sm:$0xff]  }
 0x3a5   : > { %v551_v8 = vpop.xlane.xlu0 %550 }
 0x3a6   : > { %v555_v16 = vsub.f32 %v543_v50, %v551_v8 }
 0x3a7   : > { %v554_v9 = vpop.xlane.xlu1 %553 }
 0x3a8   : > { %v556_v17 = vsub.f32 %v546_v56, %v554_v9  ;;  %v557_v21 = vmul.f32 1.442695, %v555_v16 }
 0x3a9   : > { %v672_v10 = vpop.xlane.xlu0 %671 }
 0x3aa   : > { %v676_v11 = vsub.f32 %v664_v55, %v672_v10  ;;  %v559_v22 = vmul.f32 1.442695, %v556_v17  ;;  %v1368_v10 = vld [vmem:[%s1785_s4 + $0x30] sm:$0xff]  }
 0x3ab   : > { %v796_v12 = vpop.xlane.xlu1 %795 }
 0x3ac   : > { %v678_v6 = vmul.f32 1.442695, %v676_v11  ;;  %v798_v13 = vsub.f32 %v788_v60, %v796_v12 }
 0x3ad   : > { %v675_v14 = vpop.xlane.xlu0 %674 }
 0x3ae   : > { %1378 = vpow2.f32 %v678_v6  ;;  %v677_v15 = vsub.f32 %v667_v63, %v675_v14  ;;  %v801_v18 = vmul.f32 1.442695, %v798_v13  ;;  %v1363_v63 = vld [vmem:[%s1785_s4 + $0x8] sm:$0xff]   ;;  %v1369_v13 = vld [vmem:[%s1785_s4 + $0x38] sm:$0xff]  }
 0x3af   : > { %1265 = vmatpush3.bf16.msra.mxu1 %v1363_v63 }
 0x3b0   : > { %v680_v4 = vmul.f32 1.442695, %v677_v15  ;;  %1266 = vmatprep.subr.bf16.mxu1 %v1482_v0 }
 0x3b1   : > { %v793_v19 = vpop.xlane.xlu0 %792 }
 0x3b2   : > { %1380 = vpow2.f32 %v680_v4  ;;  %v797_v20 = vsub.f32 %v785_v3, %v793_v19  ;;  %v1366_v3 = vld [vmem:[%s1785_s4 + $0x20] sm:$0xff]  }
 0x3b3   : > { %1382 = vpow2.f32 %v801_v18  ;;  %1267 = vmatpush3.bf16.msra.mxu1 %v1364_v1 }
 0x3b4   : > { %v799_v23 = vmul.f32 1.442695, %v797_v20  ;;  %1268 = vmatprep.subr.bf16.mxu1 %v1482_v0 }
 0x3b6   : > { %1384 = vpow2.f32 %v799_v23 }
 0x3b7   : > { %1386 = vpow2.f32 %v557_v21  ;;  %1269 = vmatpush3.bf16.msra.mxu1 %v1365_v2 }
 0x3b8   : > { %v1379_v25 = vpop.eup %1378  ;;  %1388 = vpow2.f32 %v559_v22  ;;  %1270 = vmatprep.subr.bf16.mxu1 %v1482_v0 }
 0x3b9   : > { %v682_v26 = vsel %vm424_vm2, %v1379_v25, 0.0 }
 0x3ba   : > { %683 = vadd.xlane.f32.xlu0 %v682_v26 }
 0x3bb   : > { %1271 = vmatpush3.bf16.msra.mxu1 %v1366_v3 }
 0x3bc   : > { %v1381_v27 = vpop.eup %1380  ;;  %1272 = vmatprep.subr.bf16.mxu1 %v1482_v0 }
 0x3bd   : > { %v685_v28 = vsel %vm424_vm2, %v1381_v27, 0.0  ;;  %v1383_v29 = vpop.eup %1382 }
 0x3be   : > { %686 = vadd.xlane.f32.xlu1 %v685_v28  ;;  %v806_v33 = vsel %vm424_vm2, %v1383_v29, 0.0 }
 0x3bf   : > { %1273 = vmatpush3.bf16.msra.mxu1 %v1367_v7 }
 0x3c0   : > { %v1385_v30 = vpop.eup %1384  ;;  %1274 = vmatprep.subr.bf16.mxu1 %v1482_v0 }
 0x3c1   : > { %v1387_v31 = vpop.eup %1386  ;;  %v803_v32 = vsel %vm424_vm2, %v1385_v30, 0.0 }
 0x3c2   : > { %v1389_v34 = vpop.eup %1388  ;;  %804 = vadd.xlane.f32.xlu0 %v803_v32  ;;  %807 = vadd.xlane.f32.xlu1 %v806_v33  ;;  %v561_v35 = vsel %vm424_vm2, %v1387_v31, 0.0 }
 0x3c3   : > { %v564_v36 = vsel %vm424_vm2, %v1389_v34, 0.0  ;;  %1275 = vmatpush3.bf16.msra.mxu1 %v1368_v10 }
 0x3c4   : > { %1276 = vmatprep.subr.bf16.mxu1 %v1482_v0 }
 0x3c6   : > { %562 = vadd.xlane.f32.xlu0 %v561_v35  ;;  %565 = vadd.xlane.f32.xlu1 %v564_v36 }
 0x3c7   : > { %1277 = vmatpush3.bf16.msra.mxu1 %v1369_v13 }
 0x3d7   : > { %693 = vrot.lane.b32.xlu1 %v1623_v24, %s1486_s15 }
 0x3db   : > { %814 = vrot.lane.b32.xlu1 %v1623_v24, %s1485_s8 }
 0x3dc   : > { %572 = vrot.lane.b32.xlu0 %v1623_v24, %s1484_s30 }
 0x447   : > { %v684_v37 = vpop.xlane.xlu0 %683 }
 0x44b   : > { %v687_v38 = vpop.xlane.xlu1 %686 }
 0x44f   : > { %v805_v39 = vpop.xlane.xlu0 %804  ;;  %v808_v40 = vpop.xlane.xlu1 %807 }
 0x453   : > { %v563_v42 = vpop.xlane.xlu0 %562  ;;  %v566_v43 = vpop.xlane.xlu1 %565 }
 0x454   : > { %1390 = vrcp.f32 %v563_v42 }
 0x455   : > { %1392 = vrcp.f32 %v566_v43 }
 0x456   : > { %1394 = vrcp.f32 %v687_v38  ;;  %v1170_v38 = vld [vmem:[%s1786_s5] ss:$0 sm:$0xff] }
 0x457   : > { %v573_v45 = vpop.permute.xlu0 %572  ;;  %1396 = vrcp.f32 %v684_v37  ;;  %v694_v24 = vpop.permute.xlu1 %693 }
 0x458   : > { %1233 = vmatpush3.bf16.msra.mxu0 %v573_v45  ;;  %1398 = vrcp.f32 %v805_v39 }
 0x459   : > { %1244 = vmatprep.subr.bf16.mxu0 %v1482_v0  ;;  %1400 = vrcp.f32 %v808_v40 }
 0x45b   : > { %v815_v56 = vpop.permute.xlu1 %814 }
 0x45e   : > { %v1391_v46 = vpop.eup %1390 }
 0x45f   : > { %v1393_v47 = vpop.eup %1392  ;;  %v569_v48 = vmul.f32 %v1391_v46, %v1387_v31 }
 0x460   : > { %v570_v49 = vmul.f32 %v1393_v47, %v1389_v34  ;;  %v1395_v51 = vpop.eup %1394 }
 0x461   : > { %v1397_v52 = vpop.eup %1396  ;;  %v691_v53 = vmul.f32 %v1395_v51, %v1381_v27 }
 0x462   : > { %v571_v50 = vpack.c.bf16 %v570_v49, %v569_v48  ;;  %v690_v54 = vmul.f32 %v1397_v52, %v1379_v25  ;;  %v1399_v55 = vpop.eup %1398 }
 0x463   : > { %v1401_v58 = vpop.eup %1400  ;;  %v811_v59 = vmul.f32 %v1399_v55, %v1385_v30 }
 0x464   : > { %1235 = vmatmul.mubr.msk.bf16.vlgmr.msra.gmra.mrb[12].mxu0 %vm424_vm2, %v571_v50  ;;  %v692_v57 = vpack.c.bf16 %v691_v53, %v690_v54  ;;  %v812_v60 = vmul.f32 %v1401_v58, %v1383_v29 }
 0x465   : > { %1245 = vmatpush3.bf16.msra.mxu0 %v694_v24  ;;  %1246 = vmatprep.mubr.msk.bf16.mxu0 %vm1483_vm0, %v1482_v0 }
 0x466   : > { %1256 = vmatprep.subr.bf16.mxu0 %v1482_v0  ;;  %v813_v61 = vpack.c.bf16 %v812_v60, %v811_v59 }
 0x46c   : > { %1247 = vmatmul.mubr.msk.bf16.vlgmr.msra.gmra.mrb[16].mxu0 %vm424_vm2, %v692_v57 }
 0x46d   : > { %1257 = vmatpush3.bf16.msra.mxu0 %v815_v56  ;;  %1258 = vmatprep.mubr.msk.bf16.mxu0 %vm1483_vm0, %v1482_v0 }
 0x474   : > { %1259 = vmatmul.mubr.msk.bf16.vlgmr.msra.gmra.mrb[20].mxu0 %vm424_vm2, %v813_v61 }
 0x537   : > { %v612_v5 = vpop.f32.mrb[12].mxu0 }
 0x538   : > { %v1236_v8 = vpop.f32.mrb[13].mxu0 }
 0x539   : > { %v615_v9 = vpop.f32.mrb[14].mxu0 }
 0x53a   : > { %v1344_v11 = vpack.i.bf16 %v615_v9, %v612_v5  ;;  %v1237_v12 = vpop.f32.mrb[15].mxu0 }
 0x53c   : > { %1345 = vrot.lane.b32.xlu1 %v1344_v11, %s1485_s8 }
 0x53f   : > { %v733_v6 = vpop.f32.mrb[16].mxu0 }
 0x540   : > { %v1248_v14 = vpop.f32.mrb[17].mxu0 }
 0x541   : > { %v736_v15 = vpop.f32.mrb[18].mxu0 }
 0x542   : > { %v1349_v16 = vpack.i.bf16 %v736_v15, %v733_v6  ;;  %v1249_v17 = vpop.f32.mrb[19].mxu0 }
 0x544   : > { %1350 = vrot.lane.b32.xlu0 %v1349_v16, %s1486_s15 }
 0x547   : > { %v854_v18 = vpop.f32.mrb[20].mxu0 }
 0x548   : > { %v1260_v4 = vpop.f32.mrb[21].mxu0 }
 0x549   : > { %v857_v19 = vpop.f32.mrb[22].mxu0 }
 0x54a   : > { %v1354_v20 = vpack.i.bf16 %v857_v19, %v854_v18  ;;  %v1261_v21 = vpop.f32.mrb[23].mxu0 }
 0x54c   : > { %1355 = vrot.lane.b32.xlu1 %v1354_v20, %s1484_s30  ;;  %s323_s30 = sand.u32 1, %s1464_s22  }
 0x54d   : > { %s1150_s8 = sshll.u32 %s323_s30, 4  ;;  %s1735_s16 = scalar_lea.sflag [#allocation3], %s323_s30 }
 0x54e   : > { %s325_s27 = scalar_lea.vmem [#allocation2], %s1150_s8 }
 0x54f   : > { %s1024_s28 = sshll.u32 %s325_s27, 4  ;;  %s1728_s28 = int_to_ptr.vmem [resolvable:$true] %s1024_s28 }
 0x550   : > { %s1402_s24 = scalar_lea.vmem %s1728_s28, 256  ;;  %p1409_p1 = scmp.lt.s32.totalorder %s1728_s28, %s1407_s18 }
 0x551   : > { %p1403_p12 = scmp.ne.s32.totalorder %s1728_s28, %s1402_s24  ;;  %p1410_p2 = scmp.lt.s32.totalorder %s1408_s19, %s1402_s24 }
 0x553   : > { %p1404_p13 = pnand %p1403_p12, %p1565_p4  ;;  %p1411_p3 = por %p1410_p2, %p1409_p1 }
 0x555   : > { %p1405_p0 = pneg %p1404_p13 }
 0x557   : > { %p1412_p5 = pnand %p1411_p3, %p1405_p0 }
 0x5ae   : > { %v1346_v0 = vpop.permute.xlu1 %1345 }
 0x5af   : > { %v1348_v23 = vunpack.i.h.bf16 %v1346_v0  ;;  %v1347_v25 = vunpack.i.l.bf16 %v1346_v0 }
 0x5b1   : > { %v886_v29 = vsel %vm376_vm1, %v1650_v44, %v1348_v23  ;;  %v885_v30 = vsel %vm376_vm1, %v1648_v41, %v1347_v25 }
 0x5b6   : > { %v1351_v22 = vpop.permute.xlu0 %1350 }
 0x5b7   : > { %v1353_v26 = vunpack.i.h.bf16 %v1351_v22  ;;  %v1352_v27 = vunpack.i.l.bf16 %v1351_v22 }
 0x5b9   : > { %v889_v33 = vsel %vm887_vm3, %v886_v29, %v1353_v26  ;;  %v888_v34 = vsel %vm887_vm3, %v885_v30, %v1352_v27 }
 0x5be   : > { %v1356_v28 = vpop.permute.xlu1 %1355 }
 0x5bf   : > { %v1358_v31 = vunpack.i.h.bf16 %v1356_v28  ;;  %v1357_v32 = vunpack.i.l.bf16 %v1356_v28 }
 0x5c1   : > { %v892_v35 = vsel %vm890_vm4, %v889_v33, %v1358_v31  ;;  %v891_v36 = vsel %vm890_vm4, %v888_v34, %v1357_v32 }
 0x5c2   : > { %v893_v37 = vpack.c.bf16 %v892_v35, %v891_v36 }
 0x5c4   : > { %1279 = vmatmul.mubr.bf16.vlgmr.msra.gmra.mrb[8].mxu1 %v893_v37 }
 0x697   : > { %v999_v44 = vpop.f32.mrb[8].mxu1 }
 0x698   : > { %v1000_v41 = vadd.f32 %v1170_v38, %v999_v44  ;;  %v1280_v39 = vpop.f32.mrb[9].mxu1 }
 0x699   : > { %v1002_v40 = vpop.f32.mrb[10].mxu1 }
 0x69a   : > { %1006 = vst [vmem:[%s325_s27] sm:$0xff] %v1000_v41  ;;  %v1003_v42 = vadd.f32 %v1170_v38, %v1002_v40  ;;  %v1281_v43 = vpop.f32.mrb[11].mxu1 }
 0x69c   : > { %1007 = vst [vmem:[%s325_s27 + $0x8] sm:$0xff] %v1003_v42 }
 0x69d   : > { %1415 = shalt.err (!%p1412_p5)
}
 0x69e   : > { %s1416_s30 = scalar_lea.hbm %s1733_s12, 256  ;;  %s1420_s20 = scalar_lea.hbm %s1787_s6, 512 }
 0x69f   : > { %p1417_p6 = scmp.ne.s32.totalorder %s1733_s12, %s1416_s30  ;;  %p1421_p10 = scmp.lt.u32.totalorder %s1733_s12, %s1787_s6 }
 0x6a0   : > { %p1422_p11 = scmp.lt.u32.totalorder %s1420_s20, %s1416_s30  ;;  %p1424_p13 = scmp.lt.u32.totalorder %s1416_s30, %s1733_s12 }
 0x6a1   : > { %p1418_p7 = pnand %p1417_p6, %p1565_p4 }
 0x6a2   : > { %p1423_p12 = por %p1422_p11, %p1421_p10 }
 0x6a3   : > { %p1419_p9 = pneg %p1418_p7 }
 0x6a4   : > { %p1425_p0 = por %p1424_p13, %p1423_p12 }
 0x6a6   : > { %p1426_p1 = pnand %p1425_p0, %p1419_p9 }
 0x6a8   : > { %1429 = shalt.err (!%p1426_p1)
}
 0x6a9   : > { %s1488_s13 = smov 128   ;;  %s1489_s14 = smov 8  }
 0x6aa   : > { %1282 = dma.vmem_to_hbm [thread:$0]  (%p1565_p4), %s1728_s28, 256, %s1733_s12, %s1735_s16, %s1488_s13, %s1488_s13, %s1489_s14  }
 0x6ab PF: > { %p1288_p2 = scmp.ge.s32.totalorder %s1480_s26, 2  ;;  %s1039_s24 = sand.u32 1, %s1460_s21  }
 0x6ac   : > { %s1040_s17 = scalar_lea.sflag [#allocation3], %s1039_s24 }
 0x6ad   : > { %p1285_p3 = pnand %p1288_p2, %p1572_p8 }
 0x6af   : > { %1455 = dma.done.wait (!%p1285_p3), %s1040_s17, 256  }
 0x6b0   : > { %1457 = vsyncadd (!%p1285_p3), %s1040_s17, 4294967040  ;;  %s19_s26 = sadd.s32 1, %s1480_s26   ;;  %s1790_s21 = smov %s1464_s22 }
 0x6b1   : > { %p16_p5 = scmp.ge.s32.totalorder %s19_s26, 4   ;;  %s1791_s22 = smov %s1468_s23 }
 0x6b2   : > { %s1792_s23 = smov %s1578_s10  ;;  %s1793_s24 = smov %s1476_s25 }
 0x6b3   : > { %s1794_s25 = smov %s1796_s29  ;;  %18 = sbr.rel (!%p16_p5) target bundleno = 4 (0x4), region = 88 }
 0x6ba   :  { %1045 = vsyncpa [#allocation3], 1 }
 0x6bb   :  { %1047 = vsyncpa [#allocation3 + $0x1], 1 }

</bundles_post_ra>
